<compile_context>
chip_gen: v5e
topology: v5e:2x2
jax: 0.10.0
libtpu: 0.0.40
codegen_flags: <defaults>
</compile_context>

<pallas_src>
import jax
import jax.numpy as jnp
from jax.experimental import pallas as pl
from jax.experimental.pallas import tpu as pltpu


# --------------------------------------------------------------------------
# Kernel: out(1, TB) = w0*x0 + w1*x1 + w2*x2 + b   (all on the VPU)
# --------------------------------------------------------------------------
def fused_affine_kernel(coef_ref, xt_ref, o_ref):
    # coef_ref: SMEM (4,)  = [w_eff0, w_eff1, w_eff2, b_eff]
    # xt_ref  : VMEM (3, TB) input transposed (features on sublanes, batch on lanes)
    # o_ref   : VMEM (1, TB)
    xt = xt_ref[...]
    o_ref[...] = (
        coef_ref[0] * xt[0:1, :]
        + coef_ref[1] * xt[1:2, :]
        + coef_ref[2] * xt[2:3, :]
        + coef_ref[3]
    )


def small_model_forward(x, params, *, max_lane_tile=65536):
    """x: (B, 3) f32 -> (B, 1) f32, semantics of SmallModel.forward."""
    B = x.shape[0]

    # ---- Trace-time fold: Linear(3,2) ∘ Linear(2,1) -> single (3,)+scalar ----
    w_eff = (params["w1"] @ params["w2"].T).reshape(3)                       # (3,)
    b_eff = (params["b1"] @ params["w2"].T + params["b2"]).reshape(1)        # (1,)
    coef = jnp.concatenate([w_eff, b_eff]).astype(jnp.float32)               # (4,)

    # ---- Lane-dense layout: batch on the 128-lane axis ----
    TB = min(max_lane_tile, max(128, pl.next_power_of_2(B)))                 # mult of 128
    nb = pl.cdiv(B, TB)
    Bp = nb * TB
    xt = jnp.zeros((3, Bp), jnp.float32).at[:, :B].set(x.T.astype(jnp.float32))

    y = pl.pallas_call(
        fused_affine_kernel,
        out_shape=jax.ShapeDtypeStruct((1, Bp), jnp.float32),
        grid=(nb,),
        in_specs=[
            pl.BlockSpec(memory_space=pltpu.MemorySpace.SMEM),               # coef
            pl.BlockSpec((3, TB), lambda i: (0, i)),                         # xt
        ],
        out_specs=pl.BlockSpec((1, TB), lambda i: (0, i)),
        compiler_params=pltpu.CompilerParams(
            dimension_semantics=("parallel",),
            vmem_limit_bytes=32 * 1024 * 1024,
        ),
        cost_estimate=pl.CostEstimate(
            flops=6 * Bp,
            transcendentals=0,
            bytes_accessed=(3 * Bp + Bp) * 4 + 16,
        ),
    )(coef, xt)

    return y[0, :B].reshape(B, 1)


# --------------------------------------------------------------------------
# Pure-JAX reference (two-step, un-folded) for correctness checking
# --------------------------------------------------------------------------
def reference_forward(x, params):
    h = x @ params["w1"] + params["b1"]          # fc1
    return h @ params["w2"].T + params["b2"]     # fc2


if __name__ == "__main__":
    B = 2
    key = jax.random.PRNGKey(0)
    kx, kw1, kb1 = jax.random.split(key, 3)

    # Input batch (B, 3) -- matches nn.Linear(3, 2) input features.
    x = jax.random.normal(kx, (B, 3), jnp.float32)

    # fc1: Linear(3, 2) with deterministic random init (stored as (in, out)).
    w1 = jax.random.normal(kw1, (3, 2), jnp.float32) * 0.5
    b1 = (jax.random.normal(kb1, (2,), jnp.float32) * 0.5).reshape(1, 2)

    # fc2: Linear(2, 1) with the fixed weights from the PyTorch module.
    w2 = jnp.array([[2.0, 5.0]], dtype=jnp.float32)  # (1, 2)
    b2 = jnp.array([[3.0]], dtype=jnp.float32)       # (1, 1)

    params = {"w1": w1, "b1": b1, "w2": w2, "b2": b2}

    out = jax.block_until_ready(small_model_forward(x, params))
    assert out.shape == (B, 1), out.shape

    ref = jax.block_until_ready(reference_forward(x, params))
    assert jnp.allclose(out, ref, atol=1e-5, rtol=1e-5), (out, ref)

    print("KERNEL_OK")
</pallas_src>

<mosaic_0001>
module attributes {stable_mosaic.version = 11 : i64} {
  func.func @fused_affine_kernel(%arg0: i32, %arg1: memref<4xf32, #tpu.memory_space<smem>>, %arg2: memref<3x128xf32, #tpu.memory_space<vmem>>, %arg3: memref<1x128xf32, #tpu.memory_space<vmem>>) attributes {dimension_semantics = [#tpu.dimension_semantics<parallel>], iteration_bounds = array<i64: 1>, scalar_prefetch = 0 : i64, scratch_operands = 0 : i64, tpu.core_type = #tpu.core_type<tc>, window_params = [{transform_indices = @transform_0, window_bounds = array<i64: 4>}, {transform_indices = @transform_1, window_bounds = array<i64: 3, 128>}, {transform_indices = @transform_2, window_bounds = array<i64: 1, 128>}]} {
    %c0 = arith.constant 0 : index
    %c0_0 = arith.constant 0 : index
    %0 = vector.load %arg2[%c0, %c0_0] : memref<3x128xf32, #tpu.memory_space<vmem>>, vector<3x128xf32>
    %c0_1 = arith.constant 0 : index
    %1 = memref.load %arg1[%c0_1] : memref<4xf32, #tpu.memory_space<smem>>
    %2 = vector.extract_strided_slice %0 {offsets = [0, 0], sizes = [1, 128], strides = [1, 1]} : vector<3x128xf32> to vector<1x128xf32>
    %3 = vector.broadcast %1 : f32 to vector<1x128xf32>
    %4 = arith.mulf %3, %2 : vector<1x128xf32>
    %c1 = arith.constant 1 : index
    %5 = memref.load %arg1[%c1] : memref<4xf32, #tpu.memory_space<smem>>
    %6 = vector.extract_strided_slice %0 {offsets = [1, 0], sizes = [1, 128], strides = [1, 1]} : vector<3x128xf32> to vector<1x128xf32>
    %7 = vector.broadcast %5 : f32 to vector<1x128xf32>
    %8 = arith.mulf %7, %6 : vector<1x128xf32>
    %9 = arith.addf %4, %8 : vector<1x128xf32>
    %c2 = arith.constant 2 : index
    %10 = memref.load %arg1[%c2] : memref<4xf32, #tpu.memory_space<smem>>
    %11 = vector.extract_strided_slice %0 {offsets = [2, 0], sizes = [1, 128], strides = [1, 1]} : vector<3x128xf32> to vector<1x128xf32>
    %12 = vector.broadcast %10 : f32 to vector<1x128xf32>
    %13 = arith.mulf %12, %11 : vector<1x128xf32>
    %14 = arith.addf %9, %13 : vector<1x128xf32>
    %c3 = arith.constant 3 : index
    %15 = memref.load %arg1[%c3] : memref<4xf32, #tpu.memory_space<smem>>
    %16 = vector.broadcast %15 : f32 to vector<1x128xf32>
    %17 = arith.addf %14, %16 : vector<1x128xf32>
    %c0_2 = arith.constant 0 : index
    %c0_3 = arith.constant 0 : index
    %18 = vector.load %arg3[%c0_2, %c0_3] : memref<1x128xf32, #tpu.memory_space<vmem>>, vector<1x128xf32>
    tpu.vector_store %arg3[%c0_2, %c0_3], %17 {strides = array<i32>} : memref<1x128xf32, #tpu.memory_space<vmem>>, vector<1x128xf32>,
    return
  }
  func.func @transform_0(%arg0: i32) -> i32 {
    %c0_i32 = arith.constant 0 : i32
    %c0_i32_0 = arith.constant 0 : i32
    return %c0_i32 : i32
  }
  func.func @transform_1(%arg0: i32) -> (i32, i32) {
    %c0_i32 = arith.constant 0 : i32
    %c0_i32_0 = arith.constant 0 : i32
    return %c0_i32, %arg0 : i32, i32
  }
  func.func @transform_2(%arg0: i32) -> (i32, i32) {
    %c0_i32 = arith.constant 0 : i32
    %c0_i32_0 = arith.constant 0 : i32
    return %c0_i32, %arg0 : i32, i32
  }
}

</mosaic_0001>

<bundles_post_ra>
// kernel: tpu_custom_call.1
= control target key start
LH: loop header
LB: loop body
LE: loop exit
PB: predicated region body
PF: predicated region fallthrough
CT: control target
= control target key end

     0   :  { %7 = vsyncpa [#allocation5], 0  ;;  %s178_s0 = inlined_call_operand.hbm [shape: f32[4], index: 0, kind: input, shape index: {}]   ;;  %s179_s1 = inlined_call_operand.hbm [shape: f32[3,128], index: 1, kind: input, shape index: {}]   ;;  %s180_s2 = inlined_call_operand.hbm [shape: f32[1,128], index: 2, kind: output, shape index: {}]  }
   0x1   :  { %8 = vsyncpa [#allocation3], 0 }
   0x2   :  { %9 = vsyncpa [#allocation4], 0  ;;  %s15_s11 = sshll.u32 %s178_s0, 4  ;;  %s24_s14 = sshll.u32 %s179_s1, 4  ;;  %s16_s11 = int_to_ptr.hbm [resolvable:$true] %s15_s11  ;;  %s25_s14 = int_to_ptr.hbm [resolvable:$true] %s24_s14 }
   0x3   :  { %s151_s15 = smov [#allocation2]   ;;  %s152_s16 = smov [#allocation6]  }
   0x4   :  { %18 = dma.hbm_to_smem %s16_s11, 16, %s151_s15, [#allocation5]  }
   0x5   :  { %s26_s17 = sshll.u32 %s152_s16, 4  ;;  %s27_s17 = int_to_ptr.vmem [resolvable:$true] %s26_s17 }
   0x6   :  { %29 = dma.hbm_to_vmem [thread:$0]  %s25_s14, 64, %s27_s17, [#allocation3]  }
   0x7   :  { %145 = dma.done.wait [#allocation5], 16  }
   0x8   :  { %146 = vsyncadd [#allocation5], 4294967280 }
   0x9   :  { %147 = dma.done.wait [#allocation3], 64  }
   0xa   :  { %148 = vsyncadd [#allocation3], 4294967232 }
   0xb   :  { %38 = sfence }
   0xc   :  { %s40_s18 = sld [smem:[#allocation2]]  ;;  %v39_v0 = vld [vmem:[#allocation6] sm:$0x7]  ;;  %s153_s1 = smov [#allocation7]  }
   0xd   :  { %s79_s19 = sld [smem:[#allocation2 + $0x1]]  ;;  %s66_s21 = sshll.u32 %s153_s1, 4  ;;  %s67_s21 = int_to_ptr.vmem [resolvable:$true] %s66_s21 }
   0xe   :  { %s80_s0 = sld [smem:[#allocation2 + $0x2]]  ;;  %s68_s24 = sshll.u32 %s180_s2, 4  ;;  %s69_s24 = int_to_ptr.hbm [resolvable:$true] %s68_s24 }
   0xf   :  { %s81_s20 = sld [smem:[#allocation2 + $0x3]] }
  0x12   :  { %v41_v1 = vstv %s40_s18 }
  0x13   :  { %v44_v2 = vstv %s79_s19  ;;  %v42_v3 = vmul.f32 %v41_v1, %v39_v0 }
  0x14   :  { %v45_v4 = vmul.f32 %v44_v2, %v39_v0  ;;  %v51_v5 = vstv %s80_s0 }
  0x15   :  { %v52_v6 = vmul.f32 %v51_v5, %v39_v0  ;;  %v58_v10 = vstv %s81_s20 }
  0x16   :  { %v47_v7 = vrot.slane %v45_v4, 1 }
  0x17   :  { %v54_v8 = vrot.slane %v52_v6, 2 }
  0x18   :  { %v49_v9 = vadd.f32 %v47_v7, %v42_v3 }
  0x1a   :  { %v56_v11 = vadd.f32 %v54_v8, %v49_v9 }
  0x1c   :  { %v59_v12 = vadd.f32 %v58_v10, %v56_v11 }
  0x1e   :  { %60 = vst [vmem:[#allocation7] sm:$0x1] %v59_v12 }
  0x1f   :  { %71 = dma.vmem_to_hbm [thread:$0]  %s67_s21, 16, %s69_s24, [#allocation4]  }
  0x20   :  { %149 = dma.done.wait [#allocation4], 16  }
  0x21   :  { %150 = vsyncadd [#allocation4], 4294967280 }
  0x22   :  { %76 = vsyncpa [#allocation3], 1 }
  0x23   :  { %77 = vsyncpa [#allocation4], 1 }
  0x24   :  { %78 = vsyncpa [#allocation5], 1 }

</bundles_post_ra>
